<compile_context>
chip_gen: v7x
topology: tpu7x:2x2x1
jax: 0.10.0
libtpu: 0.0.40
codegen_flags: <defaults>
</compile_context>

<pallas_src>
from functools import partial

import jax
import jax.numpy as jnp
from jax.experimental import pallas as pl
from jax.experimental.pallas import tpu as pltpu

_TM_MAX = 1024                      # max rows of x / y streamed per grid step
_LANE = 128                         # lane width: K / M alignment for the MXU
_VMEM_LIMIT = 48 * 1024 * 1024      # stay under v7x's 64 MiB physical VMEM
_XTILE_BUDGET = 12 * 1024 * 1024    # budget for the double-buffered x/y tiles


def _round_up(v, m):
    return ((v + m - 1) // m) * m


def _linear_kernel(x_ref, wt_ref, b_ref, o_ref, *, valid_k):
    # x_ref: [tm, kp]   wt_ref: [kp, mp]   b_ref: [1, mp]   o_ref block: [tm, mp]
    x = x_ref[...]
    if valid_k is not None:
        # The x block is lane-padded past the true K; those lanes hold whatever
        # was in VMEM (possibly NaN/Inf).  Zero them so the contraction only
        # sees real data + exact zeros.  Rows beyond n are also garbage, but
        # the corresponding output rows are dropped by the masked store.
        lane = jax.lax.broadcasted_iota(jnp.int32, x.shape, dimension=1)
        x = jnp.where(lane < valid_k, x, 0.0)
    y = jnp.dot(x, wt_ref[...], preferred_element_type=jnp.float32) + b_ref[...]
    o_ref[...] = y.astype(o_ref.dtype)


@partial(jax.jit, static_argnames=("out_dim",))
def _linear_forward(x, wt_p, b_p, out_dim):
    """y = x @ W^T + b given pre-padded W^T [kp, mp] and bias [1, mp]."""
    n, k = x.shape
    kp, mp = wt_p.shape
    m = out_dim

    # Row tile: multiple of 8, capped by _TM_MAX and a VMEM budget for the
    # double-buffered x / y tiles (the padded weight stays resident).
    per_row_bytes = 4 * (kp + mp) * 2
    tm_budget = max(8, (_XTILE_BUDGET // per_row_bytes) // 8 * 8)
    tm = min(_TM_MAX, _round_up(n, 8), tm_budget)

    grid = (pl.cdiv(n, tm),)

    cost = pl.CostEstimate(
        flops=2 * n * kp * mp,
        transcendentals=0,
        bytes_accessed=4 * (n * k + kp * mp + mp + n * m),
    )

    kernel = partial(_linear_kernel, valid_k=(k if k != kp else None))

    return pl.pallas_call(
        kernel,
        out_shape=jax.ShapeDtypeStruct((n, m), jnp.float32),
        grid=grid,
        in_specs=[
            pl.BlockSpec((tm, kp), lambda i: (i, 0)),   # x row tile (streamed)
            pl.BlockSpec((kp, mp), lambda i: (0, 0)),   # W^T, VMEM-resident
            pl.BlockSpec((1, mp), lambda i: (0, 0)),    # bias, VMEM-resident
        ],
        out_specs=pl.BlockSpec((tm, mp), lambda i: (i, 0)),
        compiler_params=pltpu.CompilerParams(
            dimension_semantics=("parallel",),          # megacore on v7x
            vmem_limit_bytes=_VMEM_LIMIT,
        ),
        cost_estimate=cost,
    )(x, wt_p, b_p)


class LinearRegression:
    """JAX/Pallas mirror of the PyTorch LinearRegression module (y = x W^T + b)."""

    def __init__(self, input_dim, output_dim, key):
        kw, kb = jax.random.split(key)
        # Deterministic init mimicking nn.Linear's U(-1/sqrt(fan_in), 1/sqrt(fan_in)).
        bound = 1.0 / (input_dim ** 0.5)
        self.weight = jax.random.uniform(
            kw, (output_dim, input_dim), jnp.float32, -bound, bound
        )
        self.bias = jax.random.uniform(
            kb, (output_dim,), jnp.float32, -bound, bound
        )
        self._output_dim = output_dim

        # One-time prep: transpose and zero-pad W / b to lane-aligned (128)
        # shapes so the in-kernel matmul is always MXU-native.  The padded
        # weight is small enough to stay VMEM-resident for the whole kernel.
        kp = _round_up(input_dim, _LANE)
        mp = _round_up(output_dim, _LANE)
        self._wt_p = (
            jnp.zeros((kp, mp), jnp.float32)
            .at[:input_dim, :output_dim]
            .set(self.weight.T)
        )
        self._b_p = (
            jnp.zeros((1, mp), jnp.float32).at[0, :output_dim].set(self.bias)
        )
        # TODO(synk): if kp*mp*4B ever outgrows ~8 MiB (not a realistic
        # LinearRegression), add a K/M-tiled grid + accumulator fallback.
        # TODO(synk): on v5e, storing wt_p/b_p (and casting x tiles) to bf16
        # with f32 accumulation would halve HBM traffic at reduced precision.

    def __call__(self, x):
        return _linear_forward(x, self._wt_p, self._b_p, self._output_dim)


if __name__ == "__main__":
    key = jax.random.PRNGKey(0)

    # Toy case matching the PyTorch script: 1-in / 1-out, x = [[1],[2],[3],[4]].
    model = LinearRegression(1, 1, key)
    x = jnp.array([[1.0], [2.0], [3.0], [4.0]], dtype=jnp.float32)
    y = model(x)
    jax.block_until_ready(y)
    y_ref = x @ model.weight.T + model.bias
    assert y.shape == (4, 1)
    assert jnp.allclose(y, y_ref, atol=1e-4, rtol=1e-4)

    # Larger case: multi-block row grid with a partial (masked) last row block
    # and an unaligned K (=32) handled by the in-kernel lane mask.
    k2, k3 = jax.random.split(jax.random.PRNGKey(1))
    model2 = LinearRegression(32, 8, k2)
    x2 = jax.random.normal(k3, (2500, 32), jnp.float32)
    y2 = model2(x2)
    jax.block_until_ready(y2)
    y2_ref = x2 @ model2.weight.T + model2.bias
    assert y2.shape == (2500, 8)
    # Loose tolerance: MXU default precision for f32 inputs is reduced.
    assert jnp.allclose(y2, y2_ref, atol=1e-2, rtol=1e-2)

    print("KERNEL_OK")
</pallas_src>

<mosaic_0001>
module attributes {stable_mosaic.version = 11 : i64} {
  func.func @_linear_kernel(%arg0: i32, %arg1: memref<8x128xf32, #tpu.memory_space<vmem>>, %arg2: memref<128x128xf32, #tpu.memory_space<vmem>>, %arg3: memref<1x128xf32, #tpu.memory_space<vmem>>, %arg4: memref<8x128xf32, #tpu.memory_space<vmem>>) attributes {dimension_semantics = [#tpu.dimension_semantics<parallel>], iteration_bounds = array<i64: 1>, scalar_prefetch = 0 : i64, scratch_operands = 0 : i64, tpu.core_type = #tpu.core_type<tc>, window_params = [{transform_indices = @transform_0, window_bounds = array<i64: 8, 128>}, {pipeline_mode = #tpu.pipeline_mode<synchronous>, transform_indices = @transform_1, window_bounds = array<i64: 128, 128>}, {pipeline_mode = #tpu.pipeline_mode<synchronous>, transform_indices = @transform_2, window_bounds = array<i64: 1, 128>}, {transform_indices = @transform_3, window_bounds = array<i64: 8, 128>}]} {
    %c0 = arith.constant 0 : index
    %c0_0 = arith.constant 0 : index
    %0 = vector.load %arg1[%c0, %c0_0] : memref<8x128xf32, #tpu.memory_space<vmem>>, vector<8x128xf32>
    %1 = tpu.iota {dimensions = array<i32: 1>} : vector<8x128xi32>
    %c1_i32 = arith.constant 1 : i32
    %2 = vector.broadcast %c1_i32 : i32 to vector<8x128xi32>
    %3 = arith.cmpi slt, %1, %2 : vector<8x128xi32>
    %cst = arith.constant 0.000000e+00 : f32
    %4 = vector.broadcast %cst : f32 to vector<8x128xf32>
    %5 = arith.select %3, %0, %4 : vector<8x128xi1>, vector<8x128xf32>
    %c0_1 = arith.constant 0 : index
    %c0_2 = arith.constant 0 : index
    %6 = vector.load %arg2[%c0_1, %c0_2] : memref<128x128xf32, #tpu.memory_space<vmem>>, vector<128x128xf32>
    %cst_3 = arith.constant dense<0.000000e+00> : vector<8x128xf32>
    %7 = tpu.matmul %5, %6, %cst_3 {dimension_numbers = #tpu.dot_dimension_numbers<[1], [0], [0], [1], [0, 0, 1, 1], [], []>} : vector<8x128xf32>, vector<128x128xf32>, vector<8x128xf32> -> vector<8x128xf32>
    %c0_4 = arith.constant 0 : index
    %c0_5 = arith.constant 0 : index
    %8 = vector.load %arg3[%c0_4, %c0_5] : memref<1x128xf32, #tpu.memory_space<vmem>>, vector<1x128xf32>
    %9 = vector.broadcast %8 : vector<1x128xf32> to vector<8x128xf32>
    %10 = arith.addf %7, %9 : vector<8x128xf32>
    %c0_6 = arith.constant 0 : index
    %c0_7 = arith.constant 0 : index
    %11 = vector.load %arg4[%c0_6, %c0_7] : memref<8x128xf32, #tpu.memory_space<vmem>>, vector<8x128xf32>
    tpu.vector_store %arg4[%c0_6, %c0_7], %10 {strides = array<i32>} : memref<8x128xf32, #tpu.memory_space<vmem>>, vector<8x128xf32>,
    return
  }
  func.func @transform_0(%arg0: i32) -> (i32, i32) {
    %c0_i32 = arith.constant 0 : i32
    %c0_i32_0 = arith.constant 0 : i32
    return %arg0, %c0_i32 : i32, i32
  }
  func.func @transform_1(%arg0: i32) -> (i32, i32) {
    %c0_i32 = arith.constant 0 : i32
    %c0_i32_0 = arith.constant 0 : i32
    %c0_i32_1 = arith.constant 0 : i32
    return %c0_i32, %c0_i32_0 : i32, i32
  }
  func.func @transform_2(%arg0: i32) -> (i32, i32) {
    %c0_i32 = arith.constant 0 : i32
    %c0_i32_0 = arith.constant 0 : i32
    %c0_i32_1 = arith.constant 0 : i32
    return %c0_i32, %c0_i32_0 : i32, i32
  }
  func.func @transform_3(%arg0: i32) -> (i32, i32) {
    %c0_i32 = arith.constant 0 : i32
    %c0_i32_0 = arith.constant 0 : i32
    return %arg0, %c0_i32 : i32, i32
  }
}

</mosaic_0001>

<bundles_post_ra>
// kernel: _linear_forward.1
= control target key start
LH: loop header
LB: loop body
LE: loop exit
PB: predicated region body
PF: predicated region fallthrough
CT: control target
= control target key end

     0   :  { %8 = vsyncpa [#allocation3], 0  ;;  %s275_s12 = smov [#allocation2]   ;;  %s322_s0 = inlined_call_operand.vmem [shape: f32[4,1], index: 0, kind: input, shape index: {}]   ;;  %s323_s1 = inlined_call_operand.hbm [shape: f32[128,128], index: 1, kind: input, shape index: {}]   ;;  %s324_s2 = inlined_call_operand.vmem [shape: f32[1,128], index: 2, kind: input, shape index: {}]   ;;  %s325_s3 = inlined_call_operand.vmem [shape: f32[4,1], index: 3, kind: output, shape index: {}]  }
   0x1   :  { %s16_s13 = sshll.u32 %s275_s12, 4  ;;  %s251_s16 = scalar_lea.hbm %s323_s1, 2048  ;;  %s17_s13 = int_to_ptr.vmem [resolvable:$true] %s16_s13 }
   0x2   :  { %p252_p0 = scmp.ne.s32.totalorder %s323_s1, %s251_s16  ;;  %p255_p1 = scmp.lt.u32.totalorder %s251_s16, %s323_s1 }
   0x4   :  { %p257_p2 = pnand %p255_p1, %p252_p0 }
   0x6   :  { %260 = shalt.err (!%p257_p2)
}
   0x7   :  { %s261_s21 = scalar_lea.vmem %s17_s13, 2048  ;;  %p266_p4 = scmp.lt.s32.totalorder %s17_s13, %s17_s13 }
   0x8   :  { %p262_p3 = scmp.ne.s32.totalorder %s17_s13, %s261_s21  ;;  %p267_p5 = scmp.lt.s32.totalorder %s261_s21, %s261_s21 }
   0xa   :  { %p268_p6 = por %p267_p5, %p266_p4 }
   0xc   :  { %p269_p7 = pnand %p268_p6, %p262_p3 }
   0xe   :  { %272 = shalt.err (!%p269_p7)
}
   0xf   :  { %s276_s22 = smov 128   ;;  %s277_s23 = smov 8  }
  0x10   :  { %22 = dma.hbm_to_vmem [thread:$0]  %s323_s1, 2048, %s17_s13, [#allocation3], %s276_s22, %s276_s22, %s277_s23  }
  0x11   :  { %273 = dma.done.wait [#allocation3], 2048  }
  0x12   :  { %274 = vsyncadd [#allocation3], 4294965248  ;;  %v278_v0 = vmov 0.0|0.0   ;;  %vm279_vm0 = vmmov 0   ;;  %v280_v1 = vmov 0.0   ;;  %v33_v2 = vld [vmem:[#allocation2] sm:$0xff]  ;;  %v29_v23 = vlaneseq }
  0x13   :  { %221 = vmatprep.subr.bf16.mxu0 %v278_v0  ;;  %218 = vmatprep.mubr.msk.f32.mxu0 %vm279_vm0, %v280_v1  ;;  %v34_v3 = vld [vmem:[#allocation2 + $0x8] sm:$0xff]  ;;  %v35_v4 = vld [vmem:[#allocation2 + $0x10] sm:$0xff]  ;;  %v36_v6 = vld [vmem:[#allocation2 + $0x18] sm:$0xff] }
  0x14   :  { %v222_v5 = vpack.c.bf16 %v34_v3, %v33_v2  ;;  %v225_v7 = vpack.c.bf16 %v36_v6, %v35_v4  ;;  %v37_v8 = vld [vmem:[#allocation2 + $0x20] sm:$0xff]  ;;  %v38_v9 = vld [vmem:[#allocation2 + $0x28] sm:$0xff]  ;;  %v39_v11 = vld [vmem:[#allocation2 + $0x30] sm:$0xff]  ;;  %v30_v27 = vand.u32 127, %v29_v23 }
  0x15   :  { %v228_v10 = vpack.c.bf16 %v38_v9, %v37_v8  ;;  %v40_v12 = vld [vmem:[#allocation2 + $0x38] sm:$0xff]  ;;  %v41_v14 = vld [vmem:[#allocation2 + $0x40] sm:$0xff]  ;;  %v42_v15 = vld [vmem:[#allocation2 + $0x48] sm:$0xff] }
  0x16   :  { %223 = vmatpush3.bf16.msra.mxu0 %v222_v5  ;;  %v231_v13 = vpack.c.bf16 %v40_v12, %v39_v11  ;;  %v234_v16 = vpack.c.bf16 %v42_v15, %v41_v14  ;;  %v43_v17 = vld [vmem:[#allocation2 + $0x50] sm:$0xff]  ;;  %v44_v18 = vld [vmem:[#allocation2 + $0x58] sm:$0xff]  ;;  %v45_v20 = vld [vmem:[#allocation2 + $0x60] sm:$0xff]  ;;  %vm31_vm1 = vcmp.lt.s32.totalorder %v30_v27, 1 }
  0x17   :  { %224 = vmatprep.subr.bf16.mxu0 %v278_v0  ;;  %v237_v19 = vpack.c.bf16 %v44_v18, %v43_v17  ;;  %v46_v21 = vld [vmem:[#allocation2 + $0x68] sm:$0xff]  ;;  %v47_v24 = vld [vmem:[#allocation2 + $0x70] sm:$0xff]  ;;  %v48_v25 = vld [vmem:[#allocation2 + $0x78] sm:$0xff] }
  0x18   :  { %v240_v22 = vpack.c.bf16 %v46_v21, %v45_v20  ;;  %v243_v26 = vpack.c.bf16 %v48_v25, %v47_v24  ;;  %v28_v28 = vld [vmem:[%s322_s0] sm:$0xff] }
  0x19   :  { %v167_v29 = vld [vmem:[%s324_s2] ss:$0 sm:$0xff] }
  0x1a   :  { %226 = vmatpush3.bf16.msra.mxu0 %v225_v7 }
  0x1b   :  { %227 = vmatprep.subr.bf16.mxu0 %v278_v0 }
  0x1e   :  { %229 = vmatpush3.bf16.msra.mxu0 %v228_v10 }
  0x1f   :  { %230 = vmatprep.subr.bf16.mxu0 %v278_v0 }
  0x22   :  { %232 = vmatpush3.bf16.msra.mxu0 %v231_v13 }
  0x23   :  { %233 = vmatprep.subr.bf16.mxu0 %v278_v0 }
  0x26   :  { %235 = vmatpush3.bf16.msra.mxu0 %v234_v16 }
  0x27   :  { %236 = vmatprep.subr.bf16.mxu0 %v278_v0 }
  0x2a   :  { %238 = vmatpush3.bf16.msra.mxu0 %v237_v19 }
  0x2b   :  { %239 = vmatprep.subr.bf16.mxu0 %v278_v0 }
  0x2e   :  { %241 = vmatpush3.bf16.msra.mxu0 %v240_v22 }
  0x2f   :  { %242 = vmatprep.subr.bf16.mxu0 %v278_v0 }
  0x32   :  { %244 = vmatpush3.bf16.msra.mxu0 %v243_v26 }
  0x35   :  { %219 = vmatmul.mubr.msk.f32.vlgmr.msra.gmra.mrb[0].mxu0 %vm31_vm1, %v28_v28 }
 0x108   :  { %v122_v30 = vpop.f32.mrb[0].mxu0 }
 0x109   :  { %v123_v31 = vadd.f32 %v167_v29, %v122_v30  ;;  %v220_v32 = vpop.f32.mrb[1].mxu0 }
 0x10b   :  { %126 = vst [vmem:[#allocation4] sm:$0xff] %v123_v31 }
 0x112   :  { %v144_v33 = vld [vmem:[#allocation4] sm:$0xf] }
 0x113   :  { %145 = vst [vmem:[%s325_s3] sm:$0xf] %v144_v33 }
 0x114   :  { %162 = vsyncpa [#allocation3], 1 }

</bundles_post_ra>
